<compile_context>
chip_gen: v6e
topology: v6e:2x2x1
jax: 0.10.0
libtpu: 0.0.40
codegen_flags: <defaults>
</compile_context>

<pallas_src>
import functools

import jax
import jax.numpy as jnp
from jax import lax
from jax.experimental import pallas as pl
from jax.experimental.pallas import tpu as pltpu

SMOOTH = 1.0
PAD_LOGIT = -1e30        # sigmoid(PAD_LOGIT) == 0 exactly (rare pad fallback only)
_INNER_ROWS = 256        # rows per inner compute slice (multiple of 32 -> any dtype)


def _round_up(a, b):
    return -(-a // b) * b


def _round_down(a, b):
    return (a // b) * b


def _pick_cols(total):
    """Largest lane-dense width that reshapes `total` exactly (prefer rows%8==0)."""
    for c in (512, 256, 128):
        if total % c == 0 and (total // c) % 8 == 0:
            return c, False
    for c in (512, 256, 128):
        if total % c == 0:
            return c, False
    return 128, True     # needs the (rare) padded-copy fallback


def _tpu_budget():
    """(per-input block bytes, vmem_limit_bytes) chosen from physical VMEM."""
    try:
        cap = int(pltpu.get_tpu_info().vmem_capacity_bytes)
    except Exception:
        cap = 0
    if cap >= 100 * (1 << 20):        # v4/v5e/v6e class: 128 MiB VMEM
        return 8 << 20, 64 * (1 << 20)
    return 4 << 20, 44 * (1 << 20)    # v7x class (64 MiB VMEM) / unknown


def _dice_kernel(x_ref, y_ref, opt_ref, oden_ref, *,
                 tiles_per_chunk, n_full_blocks, rows_total, n_inner, needs_mask):
    """Accumulate sum(sigmoid(x)*y) and sum(sigmoid(x)+y) into per-chunk slabs.

    Grid: (chunk, row_tile).  opt_ref / oden_ref are (1, 8, cols) per-chunk
    output blocks whose index map ignores the row_tile axis, so they stay
    resident in VMEM for the whole chunk and double as the accumulators; only
    VPU adds happen per step and the cross-lane reduce is done by the wrapper.
    """
    c = pl.program_id(0)
    t = pl.program_id(1)
    pos = c * tiles_per_chunk + t          # logical row-block index

    @pl.when(t == 0)
    def _init():
        opt_ref[...] = jnp.zeros_like(opt_ref)
        oden_ref[...] = jnp.zeros_like(oden_ref)

    tile_rows, cols = x_ref.shape
    inner_rows = tile_rows // n_inner      # static by construction

    def accum_rows(r0, valid):
        xv = x_ref[pl.ds(r0, inner_rows), :].astype(jnp.float32)
        tv = y_ref[pl.ds(r0, inner_rows), :].astype(jnp.float32)
        # Numerically stable sigmoid on the EUP approx path:
        #   e = exp(-|x|); r ~ 1/(1+e) (vrcp + 1 Newton step)
        #   p = r (x>=0)  |  e/(1+e) = 1 - r  (x<0)
        e = jnp.exp(-jnp.abs(xv))
        d = 1.0 + e
        r = pl.reciprocal(d, approx=True)
        r = r * (2.0 - d * r)              # Newton refinement -> ~f32 accuracy
        p = jnp.where(xv >= 0.0, r, 1.0 - r)
        if valid is not None:
            # Row mask for the ragged tail tile.  jnp.where (select, not mul)
            # is robust to garbage (incl. NaN/Inf) in the OOB part of the block.
            rid = lax.broadcasted_iota(jnp.int32, (inner_rows, cols), 0) + r0
            keep = rid < valid
            p = jnp.where(keep, p, 0.0)
            tv = jnp.where(keep, tv, 0.0)
        pt = p * tv
        den = p + tv
        if inner_rows % 8 == 0:
            g = inner_rows // 8
            opt_ref[...] += pt.reshape(g, 8, cols).sum(axis=0, keepdims=True)
            oden_ref[...] += den.reshape(g, 8, cols).sum(axis=0, keepdims=True)
        else:
            # Tiny inputs only (single block with a non-multiple-of-8 row count).
            opt_ref[:, 0:1, :] += pt.sum(axis=0, keepdims=True).reshape(1, 1, cols)
            oden_ref[:, 0:1, :] += den.sum(axis=0, keepdims=True).reshape(1, 1, cols)

    def sweep(valid):
        if n_inner == 1:
            accum_rows(0, valid)
        else:
            def body(g, carry):
                accum_rows(pl.multiple_of(g * inner_rows, inner_rows), valid)
                return carry
            lax.fori_loop(0, n_inner, body, 0)

    if needs_mask:
        @pl.when(pos < n_full_blocks)
        def _full_tiles():
            sweep(None)

        @pl.when(pos >= n_full_blocks)
        def _tail_tiles():
            # valid <= 0 for duplicated overflow steps -> they contribute nothing.
            sweep(rows_total - pos * tile_rows)
    else:
        sweep(None)


@jax.jit
def combined_dice_loss(x, y):
    """x: logits (N, C, H, W); y: targets with the same numel.  Scalar f32 loss.

    Perf tip: if y is a 0/1 mask, pass it (and/or x) as bfloat16 - the kernel
    upcasts internally and HBM traffic drops ~1:1 with the bytes.
    """
    total = x.size
    assert y.size == total, "x and y must have the same number of elements"

    cols, needs_pad = _pick_cols(total)
    x_flat = x.reshape(-1)
    y_flat = y.reshape(-1)
    if needs_pad:
        # TODO(synk): rare fallback (numel not a multiple of 128): one padded
        # copy of the flattened inputs.  PAD_LOGIT -> sigmoid()==0, target 0.
        padded = _round_up(total, cols)
        pad = padded - total
        x_flat = jnp.concatenate([x_flat, jnp.full((pad,), PAD_LOGIT, x_flat.dtype)])
        y_flat = jnp.concatenate([y_flat, jnp.zeros((pad,), y_flat.dtype)])
        total = padded

    rows = total // cols
    x2 = x_flat.reshape(rows, cols)
    y2 = y_flat.reshape(rows, cols)

    block_bytes, vmem_limit = _tpu_budget()
    x_isz = jnp.dtype(x.dtype).itemsize
    y_isz = jnp.dtype(y.dtype).itemsize
    blk_elt = max(x_isz, y_isz)

    inner = _INNER_ROWS
    if rows <= inner:
        tile_rows, n_inner = rows, 1                   # single exact block
    else:
        tile_target = max(inner, _round_down(block_bytes // (cols * blk_elt), inner))
        tile_rows = min(tile_target, _round_down(rows, inner))
        n_inner = tile_rows // inner

    grid_n = pl.cdiv(rows, tile_rows)                  # row blocks (last may be ragged)
    n_chunks = 2 if grid_n >= 2 else 1                 # v7x: one chunk per TensorCore
    tiles_per_chunk = pl.cdiv(grid_n, n_chunks)
    n_full_blocks = rows // tile_rows                  # blocks with no ragged tail
    overflow = n_chunks * tiles_per_chunk != grid_n    # duplicated (masked-off) steps
    needs_mask = (rows % tile_rows != 0) or overflow

    last_blk = grid_n - 1
    if overflow:
        idx_map = lambda c, t: (jnp.minimum(c * tiles_per_chunk + t, last_blk), 0)
    else:
        idx_map = lambda c, t: (c * tiles_per_chunk + t, 0)

    kernel = functools.partial(
        _dice_kernel,
        tiles_per_chunk=tiles_per_chunk,
        n_full_blocks=n_full_blocks,
        rows_total=rows,
        n_inner=n_inner,
        needs_mask=needs_mask,
    )

    part_pt, part_den = pl.pallas_call(
        kernel,
        out_shape=(
            jax.ShapeDtypeStruct((n_chunks, 8, cols), jnp.float32),
            jax.ShapeDtypeStruct((n_chunks, 8, cols), jnp.float32),
        ),
        grid_spec=pltpu.PrefetchScalarGridSpec(
            num_scalar_prefetch=0,
            grid=(n_chunks, tiles_per_chunk),
            in_specs=[
                pl.BlockSpec((tile_rows, cols), idx_map),
                pl.BlockSpec((tile_rows, cols), idx_map),
            ],
            out_specs=(
                pl.BlockSpec((1, 8, cols), lambda c, t: (c, 0, 0)),
                pl.BlockSpec((1, 8, cols), lambda c, t: (c, 0, 0)),
            ),
        ),
        compiler_params=pltpu.CompilerParams(
            dimension_semantics=("parallel", "arbitrary"),
            vmem_limit_bytes=vmem_limit,
        ),
        cost_estimate=pl.CostEstimate(
            flops=12 * total,
            transcendentals=total,
            bytes_accessed=total * (x_isz + y_isz) + 2 * n_chunks * 8 * cols * 4,
        ),
    )(x2, y2)

    inter = jnp.sum(part_pt)
    den = jnp.sum(part_den)
    dice = (2.0 * inter + SMOOTH) / (den + SMOOTH)
    return 1.0 - dice


def _reference_loss(x, y):
    """Pure-JAX reference mirroring the PyTorch module (global soft Dice)."""
    p = jax.nn.sigmoid(x.astype(jnp.float32))
    t = y.astype(jnp.float32)
    inter = jnp.sum(p * t)
    dice = (2.0 * inter + SMOOTH) / (jnp.sum(p) + jnp.sum(t) + SMOOTH)
    return 1.0 - dice


if __name__ == "__main__":
    key = jax.random.PRNGKey(0)
    kx, ky, kx2, ky2 = jax.random.split(key, 4)

    # Small shape consistent with the module's (N, C, H, W) inputs.
    N, C, H, W = 2, 4, 16, 16
    x = jax.random.normal(kx, (N, C, H, W), dtype=jnp.float32)
    y = (jax.random.uniform(ky, (N, C, H, W)) > 0.5).astype(jnp.float32)

    loss = combined_dice_loss(x, y)
    jax.block_until_ready(loss)
    ref = _reference_loss(x, y)
    assert jnp.allclose(loss, ref, atol=1e-5, rtol=1e-5), (loss, ref)

    # Larger, non-tile-even shape: exercises the inner row-group loop, the
    # masked ragged tail tile, and the dual-chunk ("parallel") grid path.
    N2, C2, H2, W2 = 4, 25, 100, 256
    x2 = jax.random.normal(kx2, (N2, C2, H2, W2), dtype=jnp.float32)
    y2 = (jax.random.uniform(ky2, (N2, C2, H2, W2)) > 0.5).astype(jnp.float32)
    loss2 = combined_dice_loss(x2, y2)
    jax.block_until_ready(loss2)
    ref2 = _reference_loss(x2, y2)
    assert jnp.allclose(loss2, ref2, atol=5e-5, rtol=5e-5), (loss2, ref2)

    print("KERNEL_OK")
</pallas_src>

<mosaic_0001>
module attributes {stable_mosaic.version = 11 : i64} {
  func.func @_dice_kernel(%arg0: i32, %arg1: i32, %arg2: memref<8x256xf32, #tpu.memory_space<vmem>>, %arg3: memref<8x256xf32, #tpu.memory_space<vmem>>, %arg4: memref<1x8x256xf32, #tpu.memory_space<vmem>>, %arg5: memref<1x8x256xf32, #tpu.memory_space<vmem>>) attributes {dimension_semantics = [#tpu.dimension_semantics<parallel>, #tpu.dimension_semantics<arbitrary>], iteration_bounds = array<i64: 1, 1>, scalar_prefetch = 0 : i64, scratch_operands = 0 : i64, tpu.core_type = #tpu.core_type<tc>, window_params = [{transform_indices = @transform_0, window_bounds = array<i64: 8, 256>}, {transform_indices = @transform_1, window_bounds = array<i64: 8, 256>}, {transform_indices = @transform_2, window_bounds = array<i64: 1, 8, 256>}, {transform_indices = @transform_3, window_bounds = array<i64: 1, 8, 256>}]} {
    %c0_i32 = arith.constant 0 : i32
    %0 = arith.cmpi eq, %arg1, %c0_i32 : i32
    %1 = arith.extui %0 : i1 to i32
    %c0_i32_0 = arith.constant 0 : i32
    %2 = arith.cmpi ne, %1, %c0_i32_0 : i32
    scf.if %2 {
      %cst_22 = arith.constant 0.000000e+00 : f32
      %35 = vector.broadcast %cst_22 : f32 to vector<1x8x256xf32>
      %c0_23 = arith.constant 0 : index
      %c0_24 = arith.constant 0 : index
      %c0_25 = arith.constant 0 : index
      %36 = vector.load %arg4[%c0_23, %c0_24, %c0_25] : memref<1x8x256xf32, #tpu.memory_space<vmem>>, vector<1x8x256xf32>
      tpu.vector_store %arg4[%c0_23, %c0_24, %c0_25], %35 {strides = array<i32>} : memref<1x8x256xf32, #tpu.memory_space<vmem>>, vector<1x8x256xf32>,
      %cst_26 = arith.constant 0.000000e+00 : f32
      %37 = vector.broadcast %cst_26 : f32 to vector<1x8x256xf32>
      %c0_27 = arith.constant 0 : index
      %c0_28 = arith.constant 0 : index
      %c0_29 = arith.constant 0 : index
      %38 = vector.load %arg5[%c0_27, %c0_28, %c0_29] : memref<1x8x256xf32, #tpu.memory_space<vmem>>, vector<1x8x256xf32>
      tpu.vector_store %arg5[%c0_27, %c0_28, %c0_29], %37 {strides = array<i32>} : memref<1x8x256xf32, #tpu.memory_space<vmem>>, vector<1x8x256xf32>,
    } else {
    }
    %c0 = arith.constant 0 : index
    %c0_1 = arith.constant 0 : index
    %3 = vector.load %arg2[%c0, %c0_1] : memref<8x256xf32, #tpu.memory_space<vmem>>, vector<8x256xf32>
    %c0_2 = arith.constant 0 : index
    %c0_3 = arith.constant 0 : index
    %4 = vector.load %arg3[%c0_2, %c0_3] : memref<8x256xf32, #tpu.memory_space<vmem>>, vector<8x256xf32>
    %5 = math.absf %3 : vector<8x256xf32>
    %cst = arith.constant 0.000000e+00 : f32
    %6 = vector.broadcast %cst : f32 to vector<8x256xf32>
    %7 = arith.subf %6, %5 : vector<8x256xf32>
    %8 = math.exp %7 : vector<8x256xf32>
    %cst_4 = arith.constant 1.000000e+00 : f32
    %9 = vector.broadcast %cst_4 : f32 to vector<8x256xf32>
    %10 = arith.addf %9, %8 : vector<8x256xf32>
    %11 = tpu.reciprocal %10 {approx = true} : vector<8x256xf32> -> vector<8x256xf32>
    %12 = arith.mulf %10, %11 : vector<8x256xf32>
    %cst_5 = arith.constant 2.000000e+00 : f32
    %13 = vector.broadcast %cst_5 : f32 to vector<8x256xf32>
    %14 = arith.subf %13, %12 : vector<8x256xf32>
    %15 = arith.mulf %11, %14 : vector<8x256xf32>
    %cst_6 = arith.constant 0.000000e+00 : f32
    %16 = vector.broadcast %cst_6 : f32 to vector<8x256xf32>
    %17 = arith.cmpf oge, %3, %16 : vector<8x256xf32>
    %cst_7 = arith.constant 1.000000e+00 : f32
    %18 = vector.broadcast %cst_7 : f32 to vector<8x256xf32>
    %19 = arith.subf %18, %15 : vector<8x256xf32>
    %20 = arith.select %17, %15, %19 : vector<8x256xi1>, vector<8x256xf32>
    %21 = arith.mulf %20, %4 : vector<8x256xf32>
    %22 = arith.addf %20, %4 : vector<8x256xf32>
    %c0_8 = arith.constant 0 : index
    %c0_9 = arith.constant 0 : index
    %c0_10 = arith.constant 0 : index
    %23 = vector.load %arg4[%c0_8, %c0_9, %c0_10] : memref<1x8x256xf32, #tpu.memory_space<vmem>>, vector<1x8x256xf32>
    %24 = vector.shape_cast %21 : vector<8x256xf32> to vector<1x8x256xf32>
    %cst_11 = arith.constant dense<0.000000e+00> : vector<8x256xf32>
    %25 = vector.multi_reduction <add>, %24, %cst_11 [0] : vector<1x8x256xf32> to vector<8x256xf32>
    %26 = vector.shape_cast %25 : vector<8x256xf32> to vector<1x8x256xf32>
    %27 = arith.addf %23, %26 : vector<1x8x256xf32>
    %c0_12 = arith.constant 0 : index
    %c0_13 = arith.constant 0 : index
    %c0_14 = arith.constant 0 : index
    %28 = vector.load %arg4[%c0_12, %c0_13, %c0_14] : memref<1x8x256xf32, #tpu.memory_space<vmem>>, vector<1x8x256xf32>
    tpu.vector_store %arg4[%c0_12, %c0_13, %c0_14], %27 {strides = array<i32>} : memref<1x8x256xf32, #tpu.memory_space<vmem>>, vector<1x8x256xf32>,
    %c0_15 = arith.constant 0 : index
    %c0_16 = arith.constant 0 : index
    %c0_17 = arith.constant 0 : index
    %29 = vector.load %arg5[%c0_15, %c0_16, %c0_17] : memref<1x8x256xf32, #tpu.memory_space<vmem>>, vector<1x8x256xf32>
    %30 = vector.shape_cast %22 : vector<8x256xf32> to vector<1x8x256xf32>
    %cst_18 = arith.constant dense<0.000000e+00> : vector<8x256xf32>
    %31 = vector.multi_reduction <add>, %30, %cst_18 [0] : vector<1x8x256xf32> to vector<8x256xf32>
    %32 = vector.shape_cast %31 : vector<8x256xf32> to vector<1x8x256xf32>
    %33 = arith.addf %29, %32 : vector<1x8x256xf32>
    %c0_19 = arith.constant 0 : index
    %c0_20 = arith.constant 0 : index
    %c0_21 = arith.constant 0 : index
    %34 = vector.load %arg5[%c0_19, %c0_20, %c0_21] : memref<1x8x256xf32, #tpu.memory_space<vmem>>, vector<1x8x256xf32>
    tpu.vector_store %arg5[%c0_19, %c0_20, %c0_21], %33 {strides = array<i32>} : memref<1x8x256xf32, #tpu.memory_space<vmem>>, vector<1x8x256xf32>,
    return
  }
  func.func @transform_0(%arg0: i32, %arg1: i32) -> (i32, i32) {
    %c1_i32 = arith.constant 1 : i32
    %0 = arith.muli %arg0, %c1_i32 : i32
    %1 = arith.addi %0, %arg1 : i32
    %c0_i32 = arith.constant 0 : i32
    %c0_i32_0 = arith.constant 0 : i32
    return %1, %c0_i32 : i32, i32
  }
  func.func @transform_1(%arg0: i32, %arg1: i32) -> (i32, i32) {
    %c1_i32 = arith.constant 1 : i32
    %0 = arith.muli %arg0, %c1_i32 : i32
    %1 = arith.addi %0, %arg1 : i32
    %c0_i32 = arith.constant 0 : i32
    %c0_i32_0 = arith.constant 0 : i32
    return %1, %c0_i32 : i32, i32
  }
  func.func @transform_2(%arg0: i32, %arg1: i32) -> (i32, i32, i32) {
    %c0_i32 = arith.constant 0 : i32
    %c0_i32_0 = arith.constant 0 : i32
    %c0_i32_1 = arith.constant 0 : i32
    return %arg0, %c0_i32, %c0_i32_0 : i32, i32, i32
  }
  func.func @transform_3(%arg0: i32, %arg1: i32) -> (i32, i32, i32) {
    %c0_i32 = arith.constant 0 : i32
    %c0_i32_0 = arith.constant 0 : i32
    %c0_i32_1 = arith.constant 0 : i32
    return %arg0, %c0_i32, %c0_i32_0 : i32, i32, i32
  }
}

</mosaic_0001>

<bundles_post_ra>
// kernel: combined_dice_loss.1
= control target key start
LH: loop header
LB: loop body
LE: loop exit
PB: predicated region body
PF: predicated region fallthrough
CT: control target
= control target key end

     0   :  { %s182_s0 = inlined_call_operand.vmem [shape: f32[8,256], index: 0, kind: input, shape index: {}]   ;;  %s183_s1 = inlined_call_operand.vmem [shape: f32[8,256], index: 1, kind: input, shape index: {}]   ;;  %s184_s2 = inlined_call_operand.vmem [shape: f32[1,8,256], index: 2, kind: output, shape index: {0}]   ;;  %s185_s3 = inlined_call_operand.vmem [shape: f32[1,8,256], index: 3, kind: output, shape index: {1}]  }
   0x1   :  { %v61_v0 = vld [vmem:[%s182_s0] sm:$0xff]  ;;  %v62_v1 = vld [vmem:[%s182_s0 + $0x8] sm:$0xff] }
   0x2   :  { %v65_v2 = vand.u32 2147483647, %v61_v0  ;;  %v66_v3 = vand.u32 2147483647, %v62_v1  ;;  %vm83_vm0 = vcmp.ge.f32.partialorder %v61_v0, 0.0  ;;  %v63_v20 = vld [vmem:[%s183_s1] sm:$0xff] }
   0x3   :  { %vm84_vm1 = vcmp.ge.f32.partialorder %v62_v1, 0.0  ;;  %v64_v22 = vld [vmem:[%s183_s1 + $0x8] sm:$0xff] }
   0x4   :  { %v67_v4 = vsub.f32 0.0, %v65_v2  ;;  %v68_v5 = vsub.f32 0.0, %v66_v3 }
   0x6   :  { %v69_v6 = vmul.f32 1.442695, %v67_v4  ;;  %v71_v7 = vmul.f32 1.442695, %v68_v5 }
   0x8   :  { %130 = vpow2.f32 %v69_v6 }
   0x9   :  { %132 = vpow2.f32 %v71_v7 }
  0x15   :  { %v131_v8 = vpop.eup %130 }
  0x16   :  { %v133_v9 = vpop.eup %132  ;;  %v73_v10 = vadd.f32 1.0, %v131_v8 }
  0x17   :  { %v74_v11 = vadd.f32 1.0, %v133_v9 }
  0x18   :  { %134 = vrcp.f32 %v73_v10 }
  0x19   :  { %136 = vrcp.f32 %v74_v11 }
  0x25   :  { %v135_v12 = vpop.eup %134 }
  0x26   :  { %v137_v13 = vpop.eup %136  ;;  %v77_v14 = vmul.f32 %v135_v12, %v73_v10 }
  0x27   :  { %v78_v15 = vmul.f32 %v137_v13, %v74_v11 }
  0x28   :  { %v79_v16 = vsub.f32 2.0, %v77_v14 }
  0x29   :  { %v80_v17 = vsub.f32 2.0, %v78_v15 }
  0x2a   :  { %v81_v18 = vmul.f32 %v135_v12, %v79_v16 }
  0x2b   :  { %v82_v19 = vmul.f32 %v137_v13, %v80_v17 }
  0x2c   :  { %v85_v21 = vsub.f32 1.0, %v81_v18 }
  0x2d   :  { %v86_v23 = vsub.f32 1.0, %v82_v19 }
  0x2e   :  { %v87_v24 = vsel %vm83_vm0, %v81_v18, %v85_v21 }
  0x2f   :  { %v89_v25 = vmul.f32 %v87_v24, %v63_v20  ;;  %v88_v26 = vsel %vm84_vm1, %v82_v19, %v86_v23  ;;  %v91_v27 = vadd.f32 %v87_v24, %v63_v20 }
  0x30   :  { %v90_v28 = vmul.f32 %v88_v26, %v64_v22  ;;  %v92_v29 = vadd.f32 %v88_v26, %v64_v22 }
  0x31   :  { %99 = vst [vmem:[%s184_s2] sm:$0xff] %v89_v25  ;;  %107 = vst [vmem:[%s185_s3] sm:$0xff] %v91_v27 }
  0x32   :  { %100 = vst [vmem:[%s184_s2 + $0x8] sm:$0xff] %v90_v28  ;;  %108 = vst [vmem:[%s185_s3 + $0x8] sm:$0xff] %v92_v29 }

</bundles_post_ra>
